<compile_context>
chip_gen: v5e
topology: v5e:2x2
jax: 0.10.0
libtpu: 0.0.40
codegen_flags: <defaults>
</compile_context>

<pallas_src>
import math
import numpy as np
import jax
import jax.numpy as jnp
from jax.experimental import pallas as pl
from jax.experimental.pallas import tpu as pltpu  # noqa: F401  (TPU backend)

# ----------------------------- model dims ---------------------------------
B = 2          # batch
S_SRC = 8      # source sequence length
S_TGT = 8      # target-text sequence length
S_KV = S_SRC + S_TGT          # per-batch key count (width of key_padding_mask)
D_MODEL = 32
N_HEADS = 4
HEAD_DIM = D_MODEL // N_HEADS
D_FF = 64
LN_EPS = 1e-5
NEG_INF = -1e9                # additive value for masked keys

BT = B * S_TGT                # flattened query rows       = 16
BK = B * S_SRC + B * S_TGT    # flattened key/value rows   = 32
HQ = N_HEADS * BT             # head-stacked query rows    = 64
OUT_LANES = 128               # lane-dense output slab width


# ------------------------------ kernel -------------------------------------
def _encoder_kernel(tgt_ref, src_ref, attn_mask_ref, head_mask_ref,
                    ln1_w_ref, ln1_b_ref, ln2_w_ref, ln2_b_ref,
                    wq_ref, bq_ref, wkv_ref, bkv_ref,
                    wo_ref, bo_ref, w1_ref, b1_ref, w2_ref, b2_ref,
                    out_ref):
    f32 = jnp.float32
    tgt = tgt_ref[...]            # [BT, D]       (flattened target_txt)
    src = src_ref[...]            # [B*S_SRC, D]  (flattened source)

    def layer_norm(x, w, b):
        mu = jnp.mean(x, axis=-1, keepdims=True)
        var = jnp.mean((x - mu) * (x - mu), axis=-1, keepdims=True)
        return (x - mu) * jax.lax.rsqrt(var + LN_EPS) * w + b

    ln1_w = ln1_w_ref[...]
    ln1_b = ln1_b_ref[...]
    q_ln = layer_norm(tgt, ln1_w, ln1_b)                  # [BT, D]
    src_ln = layer_norm(src, ln1_w, ln1_b)                # [B*S_SRC, D]
    # Key/value rows: all source rows first, then all target rows (sublane
    # concat in VMEM; key order is arbitrary because the additive mask built
    # in the wrapper encodes which keys each query may attend to).
    kv_ln = jnp.concatenate([src_ln, q_ln], axis=0)       # [BK, D]

    # Projections: Q separate (only target rows), K|V fused into one matmul.
    Q = jnp.dot(q_ln, wq_ref[...], preferred_element_type=f32) + bq_ref[...]      # [BT, D]
    KV = jnp.dot(kv_ln, wkv_ref[...], preferred_element_type=f32) + bkv_ref[...]  # [BK, 2D]
    K = KV[:, :D_MODEL]
    V = KV[:, D_MODEL:]

    # Head-stacked scores: replicate Q along sublanes (one block of BT rows per
    # head) and zero out the other heads' lanes, so a single [HQ,D] x [D,BK]
    # matmul yields every per-head score matrix stacked along sublanes.
    head_mask = head_mask_ref[...]                        # [HQ, D]
    Qh = jnp.tile(Q, (N_HEADS, 1)) * head_mask            # [HQ, D]
    scale = 1.0 / math.sqrt(HEAD_DIM)
    scores = jnp.dot(Qh, K.T, preferred_element_type=f32) * scale   # [HQ, BK]
    # Batch-block + key_padding mask, broadcast/tiled exactly once.
    scores = scores + jnp.tile(attn_mask_ref[...], (N_HEADS, 1))

    # One softmax for all heads / batches / queries (exact denominator).
    scores = scores - jnp.max(scores, axis=-1, keepdims=True)
    p = jnp.exp(scores)
    p = p / jnp.sum(p, axis=-1, keepdims=True)

    # Context: row-block h of (P @ V) equals P_h @ V; keeping only head-h lanes
    # of that block gives P_h @ V_h.  A head-mask multiply + sublane-block adds
    # reassemble the concatenated multi-head context without any lane concat.
    PV = jnp.dot(p, V, preferred_element_type=f32) * head_mask        # [HQ, D]
    ctx = PV[0:BT]
    for h in range(1, N_HEADS):
        ctx = ctx + PV[h * BT:(h + 1) * BT]                            # [BT, D]

    attn_out = jnp.dot(ctx, wo_ref[...], preferred_element_type=f32) + bo_ref[...]
    res1 = tgt + attn_out                                 # residual 1 (attention_dropout = id)

    x2 = layer_norm(res1, ln2_w_ref[...], ln2_b_ref[...])
    h1 = jnp.maximum(
        jnp.dot(x2, w1_ref[...], preferred_element_type=f32) + b1_ref[...], 0.0)
    ff = jnp.dot(h1, w2_ref[...], preferred_element_type=f32) + b2_ref[...]
    res2 = res1 + ff                                      # residual 2 (output_dropout = id)

    # Lane-dense store: pad [BT, D] -> [BT, 128] so the store is an unmasked vst.
    pad = jnp.zeros((BT, OUT_LANES - D_MODEL), f32)
    out_ref[...] = jnp.concatenate([res2, pad], axis=-1)


# ------------------------------ wrapper -------------------------------------
def _build_attention_mask(padding_mask_bool):
    """Additive mask [BT, BK]: 0 where query (batch b) may attend to key,
    NEG_INF otherwise (cross-batch keys and PyTorch key_padding_mask==True)."""
    q_batch = jnp.arange(BT) // S_TGT                                  # [BT]
    k_idx = jnp.arange(BK)                                             # [BK]
    is_src = k_idx < B * S_SRC
    k_batch = jnp.where(is_src, k_idx // S_SRC, (k_idx - B * S_SRC) // S_TGT)
    k_pos = jnp.where(is_src, k_idx % S_SRC, S_SRC + (k_idx - B * S_SRC) % S_TGT)
    padded = padding_mask_bool[k_batch, k_pos]                         # [BK]
    allowed = (k_batch[None, :] == q_batch[:, None]) & jnp.logical_not(padded)[None, :]
    return jnp.where(allowed, 0.0, NEG_INF).astype(jnp.float32)        # [BT, BK]


def mm_encoder_layer2(source, target_txt, padding_mask_bool, params):
    """source: [B, S_SRC, D], target_txt: [B, S_TGT, D],
    padding_mask_bool: [B, S_KV] over cat([source_b, target_b]) (True = ignore)."""
    tgt_flat = target_txt.reshape(BT, D_MODEL)
    src_flat = source.reshape(B * S_SRC, D_MODEL)

    attn_mask = _build_attention_mask(padding_mask_bool)               # [BT, BK]
    head_ids = jnp.repeat(jnp.arange(N_HEADS), BT)                     # [HQ]
    lane_head = jnp.arange(D_MODEL) // HEAD_DIM                        # [D]
    head_mask = (head_ids[:, None] == lane_head[None, :]).astype(jnp.float32)  # [HQ, D]

    # Fuse K and V projection weights into one [D, 2D] matmul operand.
    wkv = jnp.concatenate([params["wk"], params["wv"]], axis=1)        # [D, 2D]
    bkv = jnp.concatenate([params["bk"], params["bv"]], axis=1)        # [1, 2D]

    # Single kernel invocation (no grid): all operands are whole-array VMEM
    # blocks (total footprint well under 100 KB).
    fn = pl.pallas_call(
        _encoder_kernel,
        out_shape=jax.ShapeDtypeStruct((BT, OUT_LANES), jnp.float32),
    )
    out_padded = fn(tgt_flat, src_flat, attn_mask, head_mask,
                    params["ln1_w"], params["ln1_b"], params["ln2_w"], params["ln2_b"],
                    params["wq"], params["bq"], wkv, bkv,
                    params["wo"], params["bo"], params["w1"], params["b1"],
                    params["w2"], params["b2"])
    return out_padded[:, :D_MODEL].reshape(B, S_TGT, D_MODEL)


# --------------------------- pure-JAX reference ------------------------------
def reference(source, target_txt, padding_mask_bool, params):
    src_cat = jnp.concatenate([source, target_txt], axis=1)

    def ln(x, w, b):
        mu = x.mean(-1, keepdims=True)
        var = ((x - mu) ** 2).mean(-1, keepdims=True)
        return (x - mu) / jnp.sqrt(var + LN_EPS) * w[0] + b[0]

    q_ln = ln(target_txt, params["ln1_w"], params["ln1_b"])
    kv_ln = ln(src_cat, params["ln1_w"], params["ln1_b"])
    Q = q_ln @ params["wq"] + params["bq"][0]
    K = kv_ln @ params["wk"] + params["bk"][0]
    V = kv_ln @ params["wv"] + params["bv"][0]
    Qh = Q.reshape(B, S_TGT, N_HEADS, HEAD_DIM)
    Kh = K.reshape(B, S_KV, N_HEADS, HEAD_DIM)
    Vh = V.reshape(B, S_KV, N_HEADS, HEAD_DIM)
    scores = jnp.einsum("bqhd,bkhd->bhqk", Qh, Kh) / math.sqrt(HEAD_DIM)
    mask_add = jnp.where(padding_mask_bool, NEG_INF, 0.0)[:, None, None, :]
    scores = scores + mask_add
    p = jax.nn.softmax(scores, axis=-1)
    ctx = jnp.einsum("bhqk,bkhd->bqhd", p, Vh).reshape(B, S_TGT, D_MODEL)
    attn_out = ctx @ params["wo"] + params["bo"][0]
    res1 = target_txt + attn_out
    x2 = ln(res1, params["ln2_w"], params["ln2_b"])
    ff = jnp.maximum(x2 @ params["w1"] + params["b1"][0], 0.0) @ params["w2"] + params["b2"][0]
    return res1 + ff


# -------------------------------- main ---------------------------------------
if __name__ == "__main__":
    key = jax.random.PRNGKey(0)
    keys = jax.random.split(key, 12)

    # Inputs
    source = jax.random.normal(keys[0], (B, S_SRC, D_MODEL), jnp.float32)
    target_txt = jax.random.normal(keys[1], (B, S_TGT, D_MODEL), jnp.float32)
    # key_padding_mask over cat([source, target_txt]): mask last 2 source keys of batch 1
    padding_mask = jnp.zeros((B, S_KV), dtype=bool)
    padding_mask = padding_mask.at[1, S_SRC - 2:S_SRC].set(True)

    # Parameters (deterministic init; biases as [1, N] for clean VMEM layout).
    def w(k, shape, scale=0.05):
        return (scale * jax.random.normal(k, shape)).astype(jnp.float32)

    params = {
        "ln1_w": jnp.ones((1, D_MODEL), jnp.float32),
        "ln1_b": jnp.zeros((1, D_MODEL), jnp.float32),
        "ln2_w": jnp.ones((1, D_MODEL), jnp.float32),
        "ln2_b": jnp.zeros((1, D_MODEL), jnp.float32),
        # projection weights stored pre-transposed as [in, out]
        "wq": w(keys[2], (D_MODEL, D_MODEL)), "bq": w(keys[3], (1, D_MODEL)),
        "wk": w(keys[4], (D_MODEL, D_MODEL)), "bk": w(keys[5], (1, D_MODEL)),
        "wv": w(keys[6], (D_MODEL, D_MODEL)), "bv": w(keys[7], (1, D_MODEL)),
        "wo": w(keys[8], (D_MODEL, D_MODEL)), "bo": jnp.zeros((1, D_MODEL), jnp.float32),
        "w1": w(keys[9], (D_MODEL, D_FF)), "b1": jnp.zeros((1, D_FF), jnp.float32),
        "w2": w(keys[10], (D_FF, D_MODEL)), "b2": jnp.zeros((1, D_MODEL), jnp.float32),
    }

    out = mm_encoder_layer2(source, target_txt, padding_mask, params)
    out = jax.block_until_ready(out)

    ref = jax.block_until_ready(reference(source, target_txt, padding_mask, params))
    np.testing.assert_allclose(np.asarray(out), np.asarray(ref), rtol=1e-4, atol=1e-4)

    # TODO(synk): dropout layers are identity (eval mode); training-mode dropout
    # would need pltpu.prng_* inside the kernel.
    print("KERNEL_OK")
</pallas_src>

<mosaic_0001>
module attributes {stable_mosaic.version = 11 : i64} {
  func.func @_encoder_kernel(%arg0: memref<16x32xf32, #tpu.memory_space<vmem>>, %arg1: memref<16x32xf32, #tpu.memory_space<vmem>>, %arg2: memref<16x32xf32, #tpu.memory_space<vmem>>, %arg3: memref<64x32xf32, #tpu.memory_space<vmem>>, %arg4: memref<1x32xf32, #tpu.memory_space<vmem>>, %arg5: memref<1x32xf32, #tpu.memory_space<vmem>>, %arg6: memref<1x32xf32, #tpu.memory_space<vmem>>, %arg7: memref<1x32xf32, #tpu.memory_space<vmem>>, %arg8: memref<32x32xf32, #tpu.memory_space<vmem>>, %arg9: memref<1x32xf32, #tpu.memory_space<vmem>>, %arg10: memref<32x64xf32, #tpu.memory_space<vmem>>, %arg11: memref<1x64xf32, #tpu.memory_space<vmem>>, %arg12: memref<32x32xf32, #tpu.memory_space<vmem>>, %arg13: memref<1x32xf32, #tpu.memory_space<vmem>>, %arg14: memref<32x64xf32, #tpu.memory_space<vmem>>, %arg15: memref<1x64xf32, #tpu.memory_space<vmem>>, %arg16: memref<64x32xf32, #tpu.memory_space<vmem>>, %arg17: memref<1x32xf32, #tpu.memory_space<vmem>>, %arg18: memref<16x128xf32, #tpu.memory_space<vmem>>) attributes {dimension_semantics = [], scalar_prefetch = 0 : i64, scratch_operands = 0 : i64, tpu.core_type = #tpu.core_type<tc>} {
    %c0 = arith.constant 0 : index
    %c0_0 = arith.constant 0 : index
    %0 = vector.load %arg0[%c0, %c0_0] : memref<16x32xf32, #tpu.memory_space<vmem>>, vector<16x32xf32>
    %c0_1 = arith.constant 0 : index
    %c0_2 = arith.constant 0 : index
    %1 = vector.load %arg1[%c0_1, %c0_2] : memref<16x32xf32, #tpu.memory_space<vmem>>, vector<16x32xf32>
    %c0_3 = arith.constant 0 : index
    %c0_4 = arith.constant 0 : index
    %2 = vector.load %arg4[%c0_3, %c0_4] : memref<1x32xf32, #tpu.memory_space<vmem>>, vector<1x32xf32>
    %c0_5 = arith.constant 0 : index
    %c0_6 = arith.constant 0 : index
    %3 = vector.load %arg5[%c0_5, %c0_6] : memref<1x32xf32, #tpu.memory_space<vmem>>, vector<1x32xf32>
    %cst = arith.constant dense<0.000000e+00> : vector<16xf32>
    %4 = vector.multi_reduction <add>, %0, %cst [1] : vector<16x32xf32> to vector<16xf32>
    %5 = vector.shape_cast %4 : vector<16xf32> to vector<16x1xf32>
    %cst_7 = arith.constant 3.200000e+01 : f32
    %6 = vector.broadcast %cst_7 : f32 to vector<16x1xf32>
    %7 = arith.divf %5, %6 : vector<16x1xf32>
    %8 = vector.broadcast %7 : vector<16x1xf32> to vector<16x32xf32>
    %9 = arith.subf %0, %8 : vector<16x32xf32>
    %10 = vector.broadcast %7 : vector<16x1xf32> to vector<16x32xf32>
    %11 = arith.subf %0, %10 : vector<16x32xf32>
    %12 = arith.mulf %9, %11 : vector<16x32xf32>
    %cst_8 = arith.constant dense<0.000000e+00> : vector<16xf32>
    %13 = vector.multi_reduction <add>, %12, %cst_8 [1] : vector<16x32xf32> to vector<16xf32>
    %14 = vector.shape_cast %13 : vector<16xf32> to vector<16x1xf32>
    %cst_9 = arith.constant 3.200000e+01 : f32
    %15 = vector.broadcast %cst_9 : f32 to vector<16x1xf32>
    %16 = arith.divf %14, %15 : vector<16x1xf32>
    %17 = vector.broadcast %7 : vector<16x1xf32> to vector<16x32xf32>
    %18 = arith.subf %0, %17 : vector<16x32xf32>
    %cst_10 = arith.constant 9.99999974E-6 : f32
    %19 = vector.broadcast %cst_10 : f32 to vector<16x1xf32>
    %20 = arith.addf %16, %19 : vector<16x1xf32>
    %21 = math.rsqrt %20 : vector<16x1xf32>
    %22 = vector.broadcast %21 : vector<16x1xf32> to vector<16x32xf32>
    %23 = arith.mulf %18, %22 : vector<16x32xf32>
    %24 = vector.broadcast %2 : vector<1x32xf32> to vector<16x32xf32>
    %25 = arith.mulf %23, %24 : vector<16x32xf32>
    %26 = vector.broadcast %3 : vector<1x32xf32> to vector<16x32xf32>
    %27 = arith.addf %25, %26 : vector<16x32xf32>
    %cst_11 = arith.constant dense<0.000000e+00> : vector<16xf32>
    %28 = vector.multi_reduction <add>, %1, %cst_11 [1] : vector<16x32xf32> to vector<16xf32>
    %29 = vector.shape_cast %28 : vector<16xf32> to vector<16x1xf32>
    %cst_12 = arith.constant 3.200000e+01 : f32
    %30 = vector.broadcast %cst_12 : f32 to vector<16x1xf32>
    %31 = arith.divf %29, %30 : vector<16x1xf32>
    %32 = vector.broadcast %31 : vector<16x1xf32> to vector<16x32xf32>
    %33 = arith.subf %1, %32 : vector<16x32xf32>
    %34 = vector.broadcast %31 : vector<16x1xf32> to vector<16x32xf32>
    %35 = arith.subf %1, %34 : vector<16x32xf32>
    %36 = arith.mulf %33, %35 : vector<16x32xf32>
    %cst_13 = arith.constant dense<0.000000e+00> : vector<16xf32>
    %37 = vector.multi_reduction <add>, %36, %cst_13 [1] : vector<16x32xf32> to vector<16xf32>
    %38 = vector.shape_cast %37 : vector<16xf32> to vector<16x1xf32>
    %cst_14 = arith.constant 3.200000e+01 : f32
    %39 = vector.broadcast %cst_14 : f32 to vector<16x1xf32>
    %40 = arith.divf %38, %39 : vector<16x1xf32>
    %41 = vector.broadcast %31 : vector<16x1xf32> to vector<16x32xf32>
    %42 = arith.subf %1, %41 : vector<16x32xf32>
    %cst_15 = arith.constant 9.99999974E-6 : f32
    %43 = vector.broadcast %cst_15 : f32 to vector<16x1xf32>
    %44 = arith.addf %40, %43 : vector<16x1xf32>
    %45 = math.rsqrt %44 : vector<16x1xf32>
    %46 = vector.broadcast %45 : vector<16x1xf32> to vector<16x32xf32>
    %47 = arith.mulf %42, %46 : vector<16x32xf32>
    %48 = vector.broadcast %2 : vector<1x32xf32> to vector<16x32xf32>
    %49 = arith.mulf %47, %48 : vector<16x32xf32>
    %50 = vector.broadcast %3 : vector<1x32xf32> to vector<16x32xf32>
    %51 = arith.addf %49, %50 : vector<16x32xf32>
    %52 = tpu.concatenate %51, %27 in 0 : vector<16x32xf32>, vector<16x32xf32> -> vector<32x32xf32>
    %c0_16 = arith.constant 0 : index
    %c0_17 = arith.constant 0 : index
    %53 = vector.load %arg8[%c0_16, %c0_17] : memref<32x32xf32, #tpu.memory_space<vmem>>, vector<32x32xf32>
    %cst_18 = arith.constant dense<0.000000e+00> : vector<16x32xf32>
    %54 = tpu.matmul %27, %53, %cst_18 {dimension_numbers = #tpu.dot_dimension_numbers<[1], [0], [0], [1], [0, 0, 1, 1], [], []>} : vector<16x32xf32>, vector<32x32xf32>, vector<16x32xf32> -> vector<16x32xf32>
    %c0_19 = arith.constant 0 : index
    %c0_20 = arith.constant 0 : index
    %55 = vector.load %arg9[%c0_19, %c0_20] : memref<1x32xf32, #tpu.memory_space<vmem>>, vector<1x32xf32>
    %56 = vector.broadcast %55 : vector<1x32xf32> to vector<16x32xf32>
    %57 = arith.addf %54, %56 : vector<16x32xf32>
    %c0_21 = arith.constant 0 : index
    %c0_22 = arith.constant 0 : index
    %58 = vector.load %arg10[%c0_21, %c0_22] : memref<32x64xf32, #tpu.memory_space<vmem>>, vector<32x64xf32>
    %cst_23 = arith.constant dense<0.000000e+00> : vector<32x64xf32>
    %59 = tpu.matmul %52, %58, %cst_23 {dimension_numbers = #tpu.dot_dimension_numbers<[1], [0], [0], [1], [0, 0, 1, 1], [], []>} : vector<32x32xf32>, vector<32x64xf32>, vector<32x64xf32> -> vector<32x64xf32>
    %c0_24 = arith.constant 0 : index
    %c0_25 = arith.constant 0 : index
    %60 = vector.load %arg11[%c0_24, %c0_25] : memref<1x64xf32, #tpu.memory_space<vmem>>, vector<1x64xf32>
    %61 = vector.broadcast %60 : vector<1x64xf32> to vector<32x64xf32>
    %62 = arith.addf %59, %61 : vector<32x64xf32>
    %63 = vector.extract_strided_slice %62 {offsets = [0, 0], sizes = [32, 32], strides = [1, 1]} : vector<32x64xf32> to vector<32x32xf32>
    %64 = vector.extract_strided_slice %62 {offsets = [0, 32], sizes = [32, 32], strides = [1, 1]} : vector<32x64xf32> to vector<32x32xf32>
    %c0_26 = arith.constant 0 : index
    %c0_27 = arith.constant 0 : index
    %65 = vector.load %arg3[%c0_26, %c0_27] : memref<64x32xf32, #tpu.memory_space<vmem>>, vector<64x32xf32>
    %66 = tpu.concatenate %57, %57, %57, %57 in 0 : vector<16x32xf32>, vector<16x32xf32>, vector<16x32xf32>, vector<16x32xf32> -> vector<64x32xf32>
    %67 = arith.mulf %66, %65 : vector<64x32xf32>
    %68 = tpu.transpose %63, [1, 0] : vector<32x32xf32> -> vector<32x32xf32>
    %cst_28 = arith.constant dense<0.000000e+00> : vector<64x32xf32>
    %69 = tpu.matmul %67, %68, %cst_28 {dimension_numbers = #tpu.dot_dimension_numbers<[1], [0], [0], [1], [0, 0, 1, 1], [], []>} : vector<64x32xf32>, vector<32x32xf32>, vector<64x32xf32> -> vector<64x32xf32>
    %cst_29 = arith.constant 0.353553385 : f32
    %70 = vector.broadcast %cst_29 : f32 to vector<64x32xf32>
    %71 = arith.mulf %69, %70 : vector<64x32xf32>
    %c0_30 = arith.constant 0 : index
    %c0_31 = arith.constant 0 : index
    %72 = vector.load %arg2[%c0_30, %c0_31] : memref<16x32xf32, #tpu.memory_space<vmem>>, vector<16x32xf32>
    %73 = tpu.concatenate %72, %72, %72, %72 in 0 : vector<16x32xf32>, vector<16x32xf32>, vector<16x32xf32>, vector<16x32xf32> -> vector<64x32xf32>
    %74 = arith.addf %71, %73 : vector<64x32xf32>
    %cst_32 = arith.constant dense<0xFF800000> : vector<64xf32>
    %75 = vector.multi_reduction <maximumf>, %74, %cst_32 [1] : vector<64x32xf32> to vector<64xf32>
    %76 = vector.shape_cast %75 : vector<64xf32> to vector<64x1xf32>
    %77 = vector.broadcast %76 : vector<64x1xf32> to vector<64x32xf32>
    %78 = arith.subf %74, %77 : vector<64x32xf32>
    %79 = math.exp %78 : vector<64x32xf32>
    %cst_33 = arith.constant dense<0.000000e+00> : vector<64xf32>
    %80 = vector.multi_reduction <add>, %79, %cst_33 [1] : vector<64x32xf32> to vector<64xf32>
    %81 = vector.shape_cast %80 : vector<64xf32> to vector<64x1xf32>
    %82 = vector.broadcast %81 : vector<64x1xf32> to vector<64x32xf32>
    %83 = arith.divf %79, %82 : vector<64x32xf32>
    %cst_34 = arith.constant dense<0.000000e+00> : vector<64x32xf32>
    %84 = tpu.matmul %83, %64, %cst_34 {dimension_numbers = #tpu.dot_dimension_numbers<[1], [0], [0], [1], [0, 0, 1, 1], [], []>} : vector<64x32xf32>, vector<32x32xf32>, vector<64x32xf32> -> vector<64x32xf32>
    %85 = arith.mulf %84, %65 : vector<64x32xf32>
    %86 = vector.extract_strided_slice %85 {offsets = [0, 0], sizes = [16, 32], strides = [1, 1]} : vector<64x32xf32> to vector<16x32xf32>
    %87 = vector.extract_strided_slice %85 {offsets = [16, 0], sizes = [16, 32], strides = [1, 1]} : vector<64x32xf32> to vector<16x32xf32>
    %88 = arith.addf %86, %87 : vector<16x32xf32>
    %89 = vector.extract_strided_slice %85 {offsets = [32, 0], sizes = [16, 32], strides = [1, 1]} : vector<64x32xf32> to vector<16x32xf32>
    %90 = arith.addf %88, %89 : vector<16x32xf32>
    %91 = vector.extract_strided_slice %85 {offsets = [48, 0], sizes = [16, 32], strides = [1, 1]} : vector<64x32xf32> to vector<16x32xf32>
    %92 = arith.addf %90, %91 : vector<16x32xf32>
    %c0_35 = arith.constant 0 : index
    %c0_36 = arith.constant 0 : index
    %93 = vector.load %arg12[%c0_35, %c0_36] : memref<32x32xf32, #tpu.memory_space<vmem>>, vector<32x32xf32>
    %cst_37 = arith.constant dense<0.000000e+00> : vector<16x32xf32>
    %94 = tpu.matmul %92, %93, %cst_37 {dimension_numbers = #tpu.dot_dimension_numbers<[1], [0], [0], [1], [0, 0, 1, 1], [], []>} : vector<16x32xf32>, vector<32x32xf32>, vector<16x32xf32> -> vector<16x32xf32>
    %c0_38 = arith.constant 0 : index
    %c0_39 = arith.constant 0 : index
    %95 = vector.load %arg13[%c0_38, %c0_39] : memref<1x32xf32, #tpu.memory_space<vmem>>, vector<1x32xf32>
    %96 = vector.broadcast %95 : vector<1x32xf32> to vector<16x32xf32>
    %97 = arith.addf %94, %96 : vector<16x32xf32>
    %98 = arith.addf %0, %97 : vector<16x32xf32>
    %c0_40 = arith.constant 0 : index
    %c0_41 = arith.constant 0 : index
    %99 = vector.load %arg6[%c0_40, %c0_41] : memref<1x32xf32, #tpu.memory_space<vmem>>, vector<1x32xf32>
    %c0_42 = arith.constant 0 : index
    %c0_43 = arith.constant 0 : index
    %100 = vector.load %arg7[%c0_42, %c0_43] : memref<1x32xf32, #tpu.memory_space<vmem>>, vector<1x32xf32>
    %cst_44 = arith.constant dense<0.000000e+00> : vector<16xf32>
    %101 = vector.multi_reduction <add>, %98, %cst_44 [1] : vector<16x32xf32> to vector<16xf32>
    %102 = vector.shape_cast %101 : vector<16xf32> to vector<16x1xf32>
    %cst_45 = arith.constant 3.200000e+01 : f32
    %103 = vector.broadcast %cst_45 : f32 to vector<16x1xf32>
    %104 = arith.divf %102, %103 : vector<16x1xf32>
    %105 = vector.broadcast %104 : vector<16x1xf32> to vector<16x32xf32>
    %106 = arith.subf %98, %105 : vector<16x32xf32>
    %107 = vector.broadcast %104 : vector<16x1xf32> to vector<16x32xf32>
    %108 = arith.subf %98, %107 : vector<16x32xf32>
    %109 = arith.mulf %106, %108 : vector<16x32xf32>
    %cst_46 = arith.constant dense<0.000000e+00> : vector<16xf32>
    %110 = vector.multi_reduction <add>, %109, %cst_46 [1] : vector<16x32xf32> to vector<16xf32>
    %111 = vector.shape_cast %110 : vector<16xf32> to vector<16x1xf32>
    %cst_47 = arith.constant 3.200000e+01 : f32
    %112 = vector.broadcast %cst_47 : f32 to vector<16x1xf32>
    %113 = arith.divf %111, %112 : vector<16x1xf32>
    %114 = vector.broadcast %104 : vector<16x1xf32> to vector<16x32xf32>
    %115 = arith.subf %98, %114 : vector<16x32xf32>
    %cst_48 = arith.constant 9.99999974E-6 : f32
    %116 = vector.broadcast %cst_48 : f32 to vector<16x1xf32>
    %117 = arith.addf %113, %116 : vector<16x1xf32>
    %118 = math.rsqrt %117 : vector<16x1xf32>
    %119 = vector.broadcast %118 : vector<16x1xf32> to vector<16x32xf32>
    %120 = arith.mulf %115, %119 : vector<16x32xf32>
    %121 = vector.broadcast %99 : vector<1x32xf32> to vector<16x32xf32>
    %122 = arith.mulf %120, %121 : vector<16x32xf32>
    %123 = vector.broadcast %100 : vector<1x32xf32> to vector<16x32xf32>
    %124 = arith.addf %122, %123 : vector<16x32xf32>
    %c0_49 = arith.constant 0 : index
    %c0_50 = arith.constant 0 : index
    %125 = vector.load %arg14[%c0_49, %c0_50] : memref<32x64xf32, #tpu.memory_space<vmem>>, vector<32x64xf32>
    %cst_51 = arith.constant dense<0.000000e+00> : vector<16x64xf32>
    %126 = tpu.matmul %124, %125, %cst_51 {dimension_numbers = #tpu.dot_dimension_numbers<[1], [0], [0], [1], [0, 0, 1, 1], [], []>} : vector<16x32xf32>, vector<32x64xf32>, vector<16x64xf32> -> vector<16x64xf32>
    %c0_52 = arith.constant 0 : index
    %c0_53 = arith.constant 0 : index
    %127 = vector.load %arg15[%c0_52, %c0_53] : memref<1x64xf32, #tpu.memory_space<vmem>>, vector<1x64xf32>
    %128 = vector.broadcast %127 : vector<1x64xf32> to vector<16x64xf32>
    %129 = arith.addf %126, %128 : vector<16x64xf32>
    %cst_54 = arith.constant 0.000000e+00 : f32
    %130 = vector.broadcast %cst_54 : f32 to vector<16x64xf32>
    %131 = arith.maximumf %129, %130 : vector<16x64xf32>
    %c0_55 = arith.constant 0 : index
    %c0_56 = arith.constant 0 : index
    %132 = vector.load %arg16[%c0_55, %c0_56] : memref<64x32xf32, #tpu.memory_space<vmem>>, vector<64x32xf32>
    %cst_57 = arith.constant dense<0.000000e+00> : vector<16x32xf32>
    %133 = tpu.matmul %131, %132, %cst_57 {dimension_numbers = #tpu.dot_dimension_numbers<[1], [0], [0], [1], [0, 0, 1, 1], [], []>} : vector<16x64xf32>, vector<64x32xf32>, vector<16x32xf32> -> vector<16x32xf32>
    %c0_58 = arith.constant 0 : index
    %c0_59 = arith.constant 0 : index
    %134 = vector.load %arg17[%c0_58, %c0_59] : memref<1x32xf32, #tpu.memory_space<vmem>>, vector<1x32xf32>
    %135 = vector.broadcast %134 : vector<1x32xf32> to vector<16x32xf32>
    %136 = arith.addf %133, %135 : vector<16x32xf32>
    %137 = arith.addf %98, %136 : vector<16x32xf32>
    %cst_60 = arith.constant 0.000000e+00 : f32
    %138 = vector.broadcast %cst_60 : f32 to vector<16x96xf32>
    %139 = tpu.concatenate %137, %138 in 1 : vector<16x32xf32>, vector<16x96xf32> -> vector<16x128xf32>
    %c0_61 = arith.constant 0 : index
    %c0_62 = arith.constant 0 : index
    %140 = vector.load %arg18[%c0_61, %c0_62] : memref<16x128xf32, #tpu.memory_space<vmem>>, vector<16x128xf32>
    tpu.vector_store %arg18[%c0_61, %c0_62], %139 {strides = array<i32>} : memref<16x128xf32, #tpu.memory_space<vmem>>, vector<16x128xf32>,
    return
  }
}

</mosaic_0001>

<bundles_post_ra>
// kernel: tpu_custom_call.1
= control target key start
LH: loop header
LB: loop body
LE: loop exit
PB: predicated region body
PF: predicated region fallthrough
CT: control target
= control target key end

     0   :  { %s1482_s0 = inlined_call_operand.vmem [shape: f32[16,32], index: 0, kind: input, shape index: {}]   ;;  %s1483_s1 = inlined_call_operand.vmem [shape: f32[16,32], index: 1, kind: input, shape index: {}]   ;;  %s1484_s2 = inlined_call_operand.hbm [shape: f32[16,32], index: 2, kind: input, shape index: {}]   ;;  %s1485_s3 = inlined_call_operand.vmem [shape: f32[64,32], index: 3, kind: input, shape index: {}]   ;;  %s1486_s4 = inlined_call_operand.vmem [shape: f32[1,32], index: 4, kind: input, shape index: {}]   ;;  %s1487_s5 = inlined_call_operand.vmem [shape: f32[1,32], index: 5, kind: input, shape index: {}]   ;;  %s1488_s6 = inlined_call_operand.vmem [shape: f32[1,32], index: 6, kind: input, shape index: {}]   ;;  %s1489_s7 = inlined_call_operand.vmem [shape: f32[1,32], index: 7, kind: input, shape index: {}]   ;;  %s1490_s8 = inlined_call_operand.vmem [shape: f32[32,32], index: 8, kind: input, shape index: {}]   ;;  %s1491_s9 = inlined_call_operand.vmem [shape: f32[1,32], index: 9, kind: input, shape index: {}]   ;;  %s1492_s10 = inlined_call_operand.vmem [shape: f32[32,64], index: 10, kind: input, shape index: {}]   ;;  %s1493_s11 = inlined_call_operand.vmem [shape: f32[1,64], index: 11, kind: input, shape index: {}]   ;;  %s1494_s12 = inlined_call_operand.vmem [shape: f32[32,32], index: 12, kind: input, shape index: {}]   ;;  %s1495_s13 = inlined_call_operand.vmem [shape: f32[1,32], index: 13, kind: input, shape index: {}]   ;;  %s1496_s14 = inlined_call_operand.vmem [shape: f32[32,64], index: 14, kind: input, shape index: {}]   ;;  %s1497_s15 = inlined_call_operand.vmem [shape: f32[1,64], index: 15, kind: input, shape index: {}]   ;;  %s1498_s16 = inlined_call_operand.vmem [shape: f32[64,32], index: 16, kind: input, shape index: {}]   ;;  %s1499_s17 = inlined_call_operand.vmem [shape: f32[1,32], index: 17, kind: input, shape index: {}]   ;;  %s1500_s18 = inlined_call_operand.hbm [shape: f32[16,128], index: 18, kind: output, shape index: {}]  }
   0x1   :  { %1503 = sst [smem:[#allocation8_spill]] %s1482_s0 }
   0x2   :  { %1504 = sst [smem:[#allocation9_spill]] %s1483_s1 }
   0x3   :  { %1505 = sst [smem:[#allocation10_spill]] %s1484_s2 }
   0x4   :  { %23 = vsyncpa [#allocation3], 0 }
   0x5   :  { %24 = vsyncpa [#allocation4], 0  ;;  %s1506_s29 = sld [smem:[#allocation10_spill]]  ;;  %s1026_s0 = smov [#allocation2]  }
   0x6   :  { %s35_s19 = sshll.u32 %s1026_s0, 4  ;;  %s1027_s1 = smov 128   ;;  %s36_s19 = int_to_ptr.vmem [resolvable:$true] %s35_s19 }
   0x7   :  { %s1028_s20 = smov 8  }
   0xb   :  { %s33_s30 = sshll.u32 %s1506_s29, 4  ;;  %s34_s30 = int_to_ptr.hbm [resolvable:$true] %s33_s30 }
   0xc   :  { %41 = dma.hbm_to_vmem [thread:$0]  %s34_s30, 256, %s36_s19, [#allocation3], %s1027_s1, %s1027_s1, %s1028_s20  }
   0xd   :  { %1022 = dma.done.wait [#allocation3], 256  }
   0xe   :  { %1023 = vsyncadd [#allocation3], 4294967040  ;;  %vm82_vm0 = vcmask 261120   ;;  %s1507_s2 = sld [smem:[#allocation9_spill]]  ;;  %v1029_v8 = vmov 32.0   ;;  %v195_v35 = vld [vmem:[%s1490_s8 + $0x18] sm:$0xff] }
   0xf   :  { %s1508_s25 = sld [smem:[#allocation8_spill]]  ;;  %928 = vrcp.f32 %v1029_v8  ;;  %v232_v36 = vld [vmem:[%s1492_s10 + $0x18] sm:$0xff]  ;;  %218 = vmatpush.msra.mxu0 %v195_v35  ;;  %v194_v37 = vld [vmem:[%s1490_s8 + $0x10] sm:$0xff]  ;;  %v193_v39 = vld [vmem:[%s1490_s8 + $0x8] sm:$0xff]  ;;  %s854_s22 = sshll.u32 %s1500_s18, 4  ;;  %s855_s22 = int_to_ptr.hbm [resolvable:$true] %s854_s22 }
  0x10   :  { %255 = vmatpush.msra.mxu1 %v232_v36  ;;  %v231_v38 = vld [vmem:[%s1492_s10 + $0x10] sm:$0xff]  ;;  %v230_v40 = vld [vmem:[%s1492_s10 + $0x8] sm:$0xff]  ;;  %v192_v41 = vld [vmem:[%s1490_s8] sm:$0xff] }
  0x11   :  { %219 = vmatpush.msra.mxu0 %v194_v37  ;;  %v229_v42 = vld [vmem:[%s1492_s10] sm:$0xff] }
  0x12   :  { %256 = vmatpush.msra.mxu1 %v231_v38 }
  0x13   :  { %220 = vmatpush.msra.mxu0 %v193_v39  ;;  %v922_v39 = vld [vmem:[%s1493_s11] ss:$0 sm:$0xff] }
  0x14   :  { %v78_v0 = vld [vmem:[%s1507_s2] sm:$0xff]  ;;  %v79_v4 = vld [vmem:[%s1507_s2 + $0x8] sm:$0xff]  ;;  %257 = vmatpush.msra.mxu1 %v230_v40 }
  0x15   :  { %v1139_v1 = vld [vmem:[%s1508_s25] sm:$0xff]  ;;  %v144_v2 = vsel %vm82_vm0, %v78_v0, 0.0  ;;  %v1150_v5 = vld [vmem:[%s1508_s25 + $0x8] sm:$0xff]  ;;  %v147_v6 = vsel %vm82_vm0, %v79_v4, 0.0  ;;  %v929_v9 = vpop.eup %928  ;;  %221 = vmatpush.msra.mxu0 %v192_v41 }
  0x16   :  { %v83_v3 = vsel %vm82_vm0, %v1139_v1, 0.0  ;;  %145 = vadd.xlane.f32.xlu0 %v144_v2  ;;  %v86_v7 = vsel %vm82_vm0, %v1150_v5, 0.0  ;;  %v90_v10 = vmul.f32 32.0, %v929_v9  ;;  %vm94_vm1 = vweird.f32 %v929_v9  ;;  %258 = vmatpush.msra.mxu1 %v229_v42 }
  0x17   :  { %84 = vadd.xlane.f32.xlu1 %v83_v3 }
  0x18   :  { %v91_v11 = vsub.f32 1.0, %v90_v10 }
  0x1a   :  { %v92_v12 = vmul.f32 %v929_v9, %v91_v11 }
  0x1c   :  { %v93_v13 = vadd.f32 %v929_v9, %v92_v12 }
  0x1e   :  { %148 = vadd.xlane.f32.xlu0 %v147_v6  ;;  %v1155_v14 = vsel %vm94_vm1, %v929_v9, %v93_v13  ;;  %v919_v9 = vld [vmem:[%s1486_s4] ss:$0 sm:$0xff] }
  0x1f   :  { %87 = vadd.xlane.f32.xlu1 %v86_v7 }
  0x89   :  { %v146_v15 = vpop.xlane.xlu0 %145 }
  0x8a   :  { %v85_v16 = vpop.xlane.xlu1 %84  ;;  %v150_v17 = vmul.f32 %v146_v15, %v1155_v14  ;;  %v920_v15 = vld [vmem:[%s1487_s5] ss:$0 sm:$0xff] }
  0x8b   :  { %v96_v18 = vmul.f32 %v1155_v14, %v85_v16 }
  0x8c   :  { %v1159_v19 = vsub.f32 %v78_v0, %v150_v17 }
  0x8d   :  { %v1162_v20 = vsub.f32 %v1139_v1, %v96_v18 }
  0x8e   :  { %v154_v21 = vmul.f32 %v1159_v19, %v1159_v19 }
  0x8f   :  { %v100_v22 = vmul.f32 %v1162_v20, %v1162_v20 }
  0x90   :  { %v156_v23 = vsel %vm82_vm0, %v154_v21, 0.0 }
  0x91   :  { %v102_v24 = vsel %vm82_vm0, %v100_v22, 0.0  ;;  %157 = vadd.xlane.f32.xlu2 %v156_v23  ;;  %v149_v25 = vpop.xlane.xlu0 %148 }
  0x92   :  { %103 = vadd.xlane.f32.xlu0 %v102_v24  ;;  %v88_v26 = vpop.xlane.xlu1 %87  ;;  %v151_v27 = vmul.f32 %v149_v25, %v1155_v14 }
  0x93   :  { %v97_v28 = vmul.f32 %v1155_v14, %v88_v26 }
  0x94   :  { %v1172_v29 = vsub.f32 %v79_v4, %v151_v27 }
  0x95   :  { %v1175_v30 = vsub.f32 %v1150_v5, %v97_v28 }
  0x96   :  { %v155_v31 = vmul.f32 %v1172_v29, %v1172_v29 }
  0x97   :  { %v101_v32 = vmul.f32 %v1175_v30, %v1175_v30 }
  0x98   :  { %v159_v33 = vsel %vm82_vm0, %v155_v31, 0.0 }
  0x99   :  { %v105_v34 = vsel %vm82_vm0, %v101_v32, 0.0  ;;  %160 = vadd.xlane.f32.xlu2 %v159_v33 }
  0x9a   :  { %106 = vadd.xlane.f32.xlu1 %v105_v34 }
 0x104   :  { %v158_v43 = vpop.xlane.xlu2 %157 }
 0x105   :  { %v104_v44 = vpop.xlane.xlu0 %103  ;;  %v162_v45 = vmul.f32 %v158_v43, %v1155_v14 }
 0x106   :  { %v108_v46 = vmul.f32 %v104_v44, %v1155_v14 }
 0x107   :  { %v164_v47 = vadd.f32 1e-05, %v162_v45 }
 0x108   :  { %v110_v48 = vadd.f32 1e-05, %v108_v46 }
 0x109   :  { %930 = vrsqrt.f32 %v164_v47  ;;  %vm172_vm5 = vweird.f32 %v164_v47 }
 0x10a   :  { %932 = vrsqrt.f32 %v110_v48  ;;  %vm118_vm2 = vweird.f32 %v110_v48 }
 0x10c   :  { %v161_v49 = vpop.xlane.xlu2 %160 }
 0x10d   :  { %v107_v50 = vpop.xlane.xlu1 %106  ;;  %v163_v51 = vmul.f32 %v161_v49, %v1155_v14 }
 0x10e   :  { %v109_v52 = vmul.f32 %v107_v50, %v1155_v14 }
 0x10f   :  { %v931_v53 = vpop.eup %930  ;;  %v165_v54 = vadd.f32 1e-05, %v163_v51 }
 0x110   :  { %v111_v55 = vadd.f32 1e-05, %v109_v52  ;;  %v933_v56 = vpop.eup %932  ;;  %v167_v57 = vmul.f32 %v931_v53, %v164_v47  ;;  %vm173_vm4 = vweird.f32 %v931_v53  ;;  %v1260_v52 = vld [vmem:[%s1485_s3] sm:$0xff] }
 0x111   :  { %v113_v58 = vmul.f32 %v933_v56, %v110_v48  ;;  %934 = vrsqrt.f32 %v165_v54  ;;  %vm119_vm3 = vweird.f32 %v933_v56  ;;  %vm174_vm7 = vmor %vm172_vm5, %vm173_vm4  ;;  %vm182_vm11 = vweird.f32 %v165_v54  ;;  %v921_v48 = vld [vmem:[%s1491_s9] ss:$0 sm:$0xff] }
 0x112   :  { %v168_v59 = vmul.f32 %v931_v53, %v167_v57  ;;  %936 = vrsqrt.f32 %v111_v55  ;;  %vm120_vm6 = vmor %vm118_vm2, %vm119_vm3  ;;  %vm128_vm8 = vweird.f32 %v111_v55 }
 0x113   :  { %v114_v60 = vmul.f32 %v933_v56, %v113_v58  ;;  %v1285_v58 = vld [vmem:[%s1485_s3 + $0x18] sm:$0xff] }
 0x114   :  { %v169_v61 = vmul.f32 0.5, %v168_v59 }
 0x115   :  { %v115_v62 = vmul.f32 0.5, %v114_v60  ;;  %v1292_v60 = vld [vmem:[%s1485_s3 + $0x20] sm:$0xff] }
 0x116   :  { %v170_v63 = vsub.f32 1.5, %v169_v61 }
 0x117   :  { %v935_v0 = vpop.eup %934  ;;  %v116_v2 = vsub.f32 1.5, %v115_v62  ;;  %v1299_v62 = vld [vmem:[%s1485_s3 + $0x28] sm:$0xff] }
 0x118   :  { %v937_v3 = vpop.eup %936  ;;  %v171_v4 = vmul.f32 %v931_v53, %v170_v63  ;;  %v177_v6 = vmul.f32 %v935_v0, %v165_v54  ;;  %vm183_vm10 = vweird.f32 %v935_v0 }
 0x119   :  { %v117_v7 = vmul.f32 %v933_v56, %v116_v2  ;;  %v123_v8 = vmul.f32 %v937_v3, %v111_v55  ;;  %vm129_vm9 = vweird.f32 %v937_v3  ;;  %vm184_vm13 = vmor %vm182_vm11, %vm183_vm10 }
 0x11a   :  { %v175_v10 = vsel %vm174_vm7, %v931_v53, %v171_v4  ;;  %v178_v11 = vmul.f32 %v935_v0, %v177_v6  ;;  %vm130_vm12 = vmor %vm128_vm8, %vm129_vm9  ;;  %v1265_v53 = vld [vmem:[%s1485_s3 + $0x8] sm:$0xff] }
 0x11b   :  { %v121_v12 = vsel %vm120_vm6, %v933_v56, %v117_v7  ;;  %v124_v13 = vmul.f32 %v937_v3, %v123_v8  ;;  %v186_v16 = vmul.f32 %v175_v10, %v1159_v19  ;;  %v1278_v56 = vld [vmem:[%s1485_s3 + $0x10] sm:$0xff]  ;;  %v373_v7 = vld [vmem:[#allocation2] sm:$0xff] }
 0x11c   :  { %v179_v17 = vmul.f32 0.5, %v178_v11  ;;  %v132_v18 = vmul.f32 %v121_v12, %v1162_v20  ;;  %v374_v12 = vld [vmem:[#allocation2 + $0x8] sm:$0xff] }
 0x11d   :  { %v125_v21 = vmul.f32 0.5, %v124_v13  ;;  %v188_v22 = vmul.f32 %v919_v9, %v186_v16 }
 0x11e   :  { %v180_v23 = vsub.f32 1.5, %v179_v17  ;;  %v137_v24 = vmul.f32 %v919_v9, %v132_v18 }
 0x11f   :  { %v126_v25 = vsub.f32 1.5, %v125_v21  ;;  %v190_v26 = vadd.f32 %v920_v15, %v188_v22 }
 0x120   :  { %v181_v27 = vmul.f32 %v935_v0, %v180_v23  ;;  %v142_v28 = vadd.f32 %v920_v15, %v137_v24 }
 0x121   :  { %v127_v31 = vmul.f32 %v937_v3, %v126_v25  ;;  %869 = vmatmul.msk.f32.vlgmr.msra.gmra.mxu1 %vm82_vm0, %v190_v26 }
 0x122   :  { %v185_v19 = vsel %vm184_vm13, %v935_v0, %v181_v27  ;;  %867 = vmatmul.msk.f32.vlgmr.msra.gmra.mxu0 %vm82_vm0, %v142_v28  ;;  %v1306_v0 = vld [vmem:[%s1485_s3 + $0x30] sm:$0xff] }
 0x123   :  { %v131_v20 = vsel %vm130_vm12, %v937_v3, %v127_v31  ;;  %v187_v32 = vmul.f32 %v185_v19, %v1172_v29  ;;  %v1313_v3 = vld [vmem:[%s1485_s3 + $0x38] sm:$0xff]  ;;  %s1030_s3 = smov 96  }
 0x124   :  { %v133_v33 = vmul.f32 %v131_v20, %v1175_v30 }
 0x125   :  { %v189_v34 = vmul.f32 %v919_v9, %v187_v32 }
 0x126   :  { %v138_v35 = vmul.f32 %v919_v9, %v133_v33 }
 0x127   :  { %v191_v36 = vadd.f32 %v920_v15, %v189_v34 }
 0x128   :  { %v143_v37 = vadd.f32 %v920_v15, %v138_v35 }
 0x129   :  { %870 = vmatmul.msk.f32.gmra.mxu1 %vm82_vm0, %v191_v36 }
 0x12a   :  { %868 = vmatmul.msk.f32.gmra.mxu0 %vm82_vm0, %v143_v37 }
 0x131   :  { %871 = vmatmul.msk.f32.gmra.mxu1 %vm82_vm0, %v142_v28 }
 0x139   :  { %872 = vmatmul.msk.f32.gmra.mxu1 %vm82_vm0, %v143_v37 }
 0x19e   :  { %v260_v38 = vpop.f32.mrf.mxu1 }
 0x19f   :  { %v1230_v40 = vadd.f32 %v922_v39, %v260_v38  ;;  %v223_v43 = vpop.f32.mrf.mxu0 }
 0x1a0   :  { %v224_v50 = vadd.f32 %v921_v48, %v223_v43 }
 0x1a2   :  { %v280_v54 = vmul.f32 %v1260_v52, %v224_v50  ;;  %v282_v57 = vmul.f32 %v1278_v56, %v224_v50  ;;  %v284_v61 = vmul.f32 %v1292_v60, %v224_v50  ;;  %v286_v2 = vmul.f32 %v1306_v0, %v224_v50 }
 0x1a6   :  { %v263_v29 = vpop.f32.mrf.mxu1 }
 0x1a7   :  { %v1232_v30 = vadd.f32 %v922_v39, %v263_v29  ;;  %v226_v49 = vpop.f32.mrf.mxu0 }
 0x1a8   :  { %v227_v51 = vadd.f32 %v921_v48, %v226_v49 }
 0x1a9   :  { %v914_v41 = vpack.i.bf16 %v1230_v40, %v1232_v30 }
 0x1aa   :  { %v281_v55 = vmul.f32 %v1265_v53, %v227_v51  ;;  %v283_v59 = vmul.f32 %v1285_v58, %v227_v51  ;;  %v285_v63 = vmul.f32 %v1299_v62, %v227_v51  ;;  %v287_v4 = vmul.f32 %v1313_v3, %v227_v51 }
 0x1ae   :  { %v266_v42 = vpop.f32.mrf.mxu1 }
 0x1af   :  { %v1236_v45 = vadd.f32 %v922_v39, %v266_v42 }
 0x1b6   :  { %v269_v44 = vpop.f32.mrf.mxu1 }
 0x1b7   :  { %v1238_v46 = vadd.f32 %v922_v39, %v269_v44 }
 0x1b9   :  { %873 = vmatpush.xpose.msk.msrb.mxu0 %vm82_vm0, %v1238_v46  ;;  %899 = vmatpush.xpose.msk.msra.mxu2 %vm82_vm0, %v1238_v46  ;;  %v909_v47 = vpack.i.bf16 %v1236_v45, %v1238_v46 }
 0x1bd   :  { %874 = vmatpush.xpose.msk.msrb.mxu0 %vm82_vm0, %v1236_v45  ;;  %900 = vmatpush.xpose.msk.msra.mxu2 %vm82_vm0, %v1236_v45 }
 0x1c1   :  { %875 = vmatpush.xpose.msk.msrb.mxu0 %vm82_vm0, %v1232_v30  ;;  %901 = vmatpush.xpose.msk.msra.mxu2 %vm82_vm0, %v1232_v30 }
 0x1c5   :  { %876 = vmatpush.xpose.msk.msrb.mxu0 %vm82_vm0, %v1230_v40  ;;  %902 = vmatpush.xpose.msk.msra.mxu2 %vm82_vm0, %v1230_v40 }
 0x1c8   :  { %877 = vmatmul.msk.f32.vlgmr.msrb.gmra.mxu0 %vm82_vm0, %v280_v54  ;;  %878 = vmatmul.msk.f32.vlgmr.msra.gmra.mxu2 %vm82_vm0, %v281_v55 }
 0x1d0   :  { %879 = vmatmul.msk.f32.gmra.mxu2 %vm82_vm0, %v282_v57 }
 0x1d8   :  { %880 = vmatmul.msk.f32.gmra.mxu2 %vm82_vm0, %v283_v59 }
 0x1e0   :  { %881 = vmatmul.msk.f32.gmra.mxu2 %vm82_vm0, %v284_v61 }
 0x1e8   :  { %882 = vmatmul.msk.f32.gmra.mxu2 %vm82_vm0, %v285_v63 }
 0x1f0   :  { %883 = vmatmul.msk.f32.gmra.mxu2 %vm82_vm0, %v286_v2 }
 0x1f8   :  { %884 = vmatmul.msk.f32.gmra.mxu2 %vm82_vm0, %v287_v4 }
 0x245   :  { %v341_v6 = vpop.f32.mrf.mxu0 }
 0x246   :  { %v365_v8 = vmul.f32 0.35355338, %v341_v6 }
 0x248   :  { %v375_v9 = vadd.f32 %v373_v7, %v365_v8 }
 0x24a   :  { %v383_v10 = vsel %vm82_vm0, %v375_v9, -inf }
 0x24b   :  { %384 = vmax.xlane.f32.xlu2 %v383_v10  ;;  %v344_v11 = vpop.f32.mrf.mxu2 }
 0x24c   :  { %v366_v13 = vmul.f32 0.35355338, %v344_v11 }
 0x24e   :  { %v376_v15 = vadd.f32 %v374_v12, %v366_v13 }
 0x250   :  { %v386_v16 = vsel %vm82_vm0, %v376_v15, -inf }
 0x251   :  { %387 = vmax.xlane.f32.xlu0 %v386_v16 }
 0x253   :  { %v347_v17 = vpop.f32.mrf.mxu2 }
 0x254   :  { %v367_v18 = vmul.f32 0.35355338, %v347_v17 }
 0x256   :  { %v377_v21 = vadd.f32 %v373_v7, %v367_v18 }
 0x258   :  { %v389_v22 = vsel %vm82_vm0, %v377_v21, -inf }
 0x259   :  { %390 = vmax.xlane.f32.xlu1 %v389_v22 }
 0x25b   :  { %v350_v23 = vpop.f32.mrf.mxu2 }
 0x25c   :  { %v368_v24 = vmul.f32 0.35355338, %v350_v23 }
 0x25e   :  { %v378_v25 = vadd.f32 %v374_v12, %v368_v24 }
 0x260   :  { %v392_v26 = vsel %vm82_vm0, %v378_v25, -inf }
 0x261   :  { %393 = vmax.xlane.f32.xlu2 %v392_v26 }
 0x263   :  { %v353_v27 = vpop.f32.mrf.mxu2 }
 0x264   :  { %v369_v28 = vmul.f32 0.35355338, %v353_v27 }
 0x266   :  { %v379_v31 = vadd.f32 %v373_v7, %v369_v28 }
 0x268   :  { %v395_v19 = vsel %vm82_vm0, %v379_v31, -inf }
 0x269   :  { %396 = vmax.xlane.f32.xlu0 %v395_v19 }
 0x26b   :  { %v356_v20 = vpop.f32.mrf.mxu2 }
 0x26c   :  { %v370_v32 = vmul.f32 0.35355338, %v356_v20 }
 0x26e   :  { %v380_v33 = vadd.f32 %v374_v12, %v370_v32 }
 0x270   :  { %v398_v34 = vsel %vm82_vm0, %v380_v33, -inf }
 0x271   :  { %399 = vmax.xlane.f32.xlu1 %v398_v34 }
 0x273   :  { %v359_v35 = vpop.f32.mrf.mxu2 }
 0x274   :  { %v371_v36 = vmul.f32 0.35355338, %v359_v35 }
 0x276   :  { %v381_v37 = vadd.f32 %v373_v7, %v371_v36 }
 0x278   :  { %v401_v38 = vsel %vm82_vm0, %v381_v37, -inf }
 0x279   :  { %402 = vmax.xlane.f32.xlu2 %v401_v38 }
 0x27b   :  { %v362_v39 = vpop.f32.mrf.mxu2 }
 0x27c   :  { %v372_v29 = vmul.f32 0.35355338, %v362_v39 }
 0x27e   :  { %v382_v42 = vadd.f32 %v374_v12, %v372_v29 }
 0x280   :  { %v404_v43 = vsel %vm82_vm0, %v382_v42, -inf }
 0x281   :  { %405 = vmax.xlane.f32.xlu1 %v404_v43 }
 0x2be   :  { %v385_v44 = vpop.xlane.xlu2 %384 }
 0x2bf   :  { %v407_v48 = vsub.f32 %v375_v9, %v385_v44 }
 0x2c1   :  { %v415_v49 = vmul.f32 1.442695, %v407_v48 }
 0x2c3   :  { %938 = vpow2.f32 %v415_v49 }
 0x2c4   :  { %v388_v50 = vpop.xlane.xlu0 %387 }
 0x2c5   :  { %v408_v51 = vsub.f32 %v376_v15, %v388_v50 }
 0x2c7   :  { %v417_v54 = vmul.f32 1.442695, %v408_v51 }
 0x2c9   :  { %v1325_v55 = vpop.eup %938  ;;  %940 = vpow2.f32 %v417_v54 }
 0x2ca   :  { %v431_v57 = vsel %vm82_vm0, %v1325_v55, 0.0 }
 0x2cb   :  { %432 = vadd.xlane.f32.xlu0 %v431_v57 }
 0x2cc   :  { %v391_v59 = vpop.xlane.xlu1 %390 }
 0x2cd   :  { %v409_v61 = vsub.f32 %v377_v21, %v391_v59 }
 0x2cf   :  { %v1329_v63 = vpop.eup %940  ;;  %v419_v2 = vmul.f32 1.442695, %v409_v61 }
 0x2d0   :  { %v434_v4 = vsel %vm82_vm0, %v1329_v63, 0.0 }
 0x2d1   :  { %942 = vpow2.f32 %v419_v2  ;;  %435 = vadd.xlane.f32.xlu2 %v434_v4 }
 0x2d4   :  { %v394_v6 = vpop.xlane.xlu2 %393 }
 0x2d5   :  { %v410_v7 = vsub.f32 %v378_v25, %v394_v6 }
 0x2d7   :  { %v1333_v8 = vpop.eup %942  ;;  %v421_v9 = vmul.f32 1.442695, %v410_v7 }
 0x2d8   :  { %v437_v10 = vsel %vm82_vm0, %v1333_v8, 0.0 }
 0x2d9   :  { %944 = vpow2.f32 %v421_v9  ;;  %438 = vadd.xlane.f32.xlu1 %v437_v10 }
 0x2dc   :  { %v397_v11 = vpop.xlane.xlu0 %396 }
 0x2dd   :  { %v411_v12 = vsub.f32 %v379_v31, %v397_v11 }
 0x2df   :  { %v1337_v13 = vpop.eup %944  ;;  %v423_v15 = vmul.f32 1.442695, %v411_v12  ;;  %910 = vrot.lane.b32.xlu0 %v909_v47, %s1030_s3 }
 0x2e0   :  { %v440_v16 = vsel %vm82_vm0, %v1337_v13, 0.0 }
 0x2e1   :  { %946 = vpow2.f32 %v423_v15  ;;  %441 = vadd.xlane.f32.xlu1 %v440_v16 }
 0x2e4   :  { %v400_v45 = vpop.xlane.xlu1 %399 }
 0x2e5   :  { %v412_v47 = vsub.f32 %v380_v33, %v400_v45 }
 0x2e7   :  { %v1344_v17 = vpop.eup %946  ;;  %v425_v25 = vmul.f32 1.442695, %v412_v47 }
 0x2e8   :  { %v443_v18 = vsel %vm82_vm0, %v1344_v17, 0.0 }
 0x2e9   :  { %915 = vrot.lane.b32.xlu2 %v914_v41, %s1030_s3  ;;  %444 = vadd.xlane.f32.xlu1 %v443_v18 }
 0x2ec   :  { %v403_v21 = vpop.xlane.xlu2 %402 }
 0x2ed   :  { %v413_v22 = vsub.f32 %v381_v37, %v403_v21 }
 0x2ef   :  { %v427_v23 = vmul.f32 1.442695, %v413_v22 }
 0x2f1   :  { %948 = vpow2.f32 %v427_v23 }
 0x2f2   :  { %950 = vpow2.f32 %v425_v25 }
 0x2f4   :  { %v406_v26 = vpop.xlane.xlu1 %405 }
 0x2f5   :  { %v414_v27 = vsub.f32 %v382_v42, %v406_v26 }
 0x2f7   :  { %v1351_v46 = vpop.eup %948  ;;  %v429_v28 = vmul.f32 1.442695, %v414_v27 }
 0x2f8   :  { %v449_v24 = vsel %vm82_vm0, %v1351_v46, 0.0  ;;  %v1355_v40 = vpop.eup %950 }
 0x2f9   :  { %450 = vadd.xlane.f32.xlu1 %v449_v24  ;;  %952 = vpow2.f32 %v429_v28  ;;  %v446_v30 = vsel %vm82_vm0, %v1355_v40, 0.0 }
 0x2ff   :  { %v1359_v41 = vpop.eup %952 }
 0x300   :  { %v452_v31 = vsel %vm82_vm0, %v1359_v41, 0.0 }
 0x309   :  { %447 = vadd.xlane.f32.xlu0 %v446_v30 }
 0x312   :  { %453 = vadd.xlane.f32.xlu2 %v452_v31 }
 0x33e   :  { %v433_v19 = vpop.xlane.xlu0 %432 }
 0x33f   :  { %954 = vrcp.f32 %v433_v19  ;;  %v466_v42 = vand.u32 2147483648, %v433_v19  ;;  %vm460_vm15 = vweird.f32 %v433_v19  ;;  %v464_v44 = vand.u32 2147483647, %v433_v19 }
 0x341   :  { %v467_v57 = vor.u32 1.1754944e-38, %v466_v42  ;;  %vm465_vm2 = vcmp.eq.f32.partialorder %v464_v44, 8.507059e+37 }
 0x344   :  { %v436_v20 = vpop.xlane.xlu2 %435 }
 0x345   :  { %v955_v32 = vpop.eup %954  ;;  %956 = vrcp.f32 %v436_v20  ;;  %v481_v10 = vand.u32 2147483648, %v436_v20  ;;  %vm475_vm4 = vweird.f32 %v436_v20  ;;  %v479_v15 = vand.u32 2147483647, %v436_v20 }
 0x346   :  { %v456_v33 = vmul.f32 %v955_v32, %v433_v19  ;;  %vm461_vm14 = vweird.f32 %v955_v32 }
 0x347   :  { %vm462_vm1 = vmor %vm460_vm15, %vm461_vm14  ;;  %v482_v22 = vor.u32 1.1754944e-38, %v481_v10  ;;  %vm480_vm6 = vcmp.eq.f32.partialorder %v479_v15, 8.507059e+37 }
 0x348   :  { %v457_v34 = vsub.f32 1.0, %v456_v33 }
 0x34a   :  { %v458_v36 = vmul.f32 %v955_v32, %v457_v34 }
 0x34b   :  { %v957_v35 = vpop.eup %956 }
 0x34c   :  { %v471_v37 = vmul.f32 %v957_v35, %v436_v20  ;;  %v439_v38 = vpop.xlane.xlu1 %438  ;;  %v459_v29 = vadd.f32 %v955_v32, %v458_v36  ;;  %v916_v51 = vpop.permute.xlu2 %915  ;;  %vm476_vm3 = vweird.f32 %v957_v35 }
 0x34d   :  { %958 = vrcp.f32 %v439_v38  ;;  %v917_v4 = vunpack.i.l.bf16 %v916_v51  ;;  %v918_v11 = vunpack.i.h.bf16 %v916_v51  ;;  %vm477_vm5 = vmor %vm475_vm4, %vm476_vm3  ;;  %v496_v26 = vand.u32 2147483648, %v439_v38 }
 0x34e   :  { %v472_v39 = vsub.f32 1.0, %v471_v37  ;;  %v463_v54 = vsel %vm462_vm1, %v955_v32, %v459_v29  ;;  %vm490_vm8 = vweird.f32 %v439_v38  ;;  %v494_v27 = vand.u32 2147483647, %v439_v38 }
 0x34f   :  { %v468_v6 = vsel %vm465_vm2, %v467_v57, %v463_v54  ;;  %v497_v19 = vor.u32 1.1754944e-38, %v496_v26 }
 0x350   :  { %v473_v50 = vmul.f32 %v957_v35, %v472_v39  ;;  %v469_v12 = vmul.f32 %v1325_v55, %v468_v6  ;;  %vm495_vm10 = vcmp.eq.f32.partialorder %v494_v27, 8.507059e+37 }
 0x351   :  { %v911_v43 = vpop.permute.xlu0 %910 }
 0x352   :  { %v912_v48 = vunpack.i.l.bf16 %v911_v43  ;;  %v913_v2 = vunpack.i.h.bf16 %v911_v43  ;;  %v474_v9 = vadd.f32 %v957_v35, %v473_v50 }
 0x353   :  { %v959_v49 = vpop.eup %958 }
 0x354   :  { %v486_v59 = vmul.f32 %v959_v49, %v439_v38  ;;  %623 = vmatpush.msra.mxu3 %v912_v48  ;;  %v442_v61 = vpop.xlane.xlu1 %441  ;;  %v478_v21 = vsel %vm477_vm5, %v957_v35, %v474_v9  ;;  %vm491_vm7 = vweird.f32 %v959_v49 }
 0x355   :  { %960 = vrcp.f32 %v442_v61  ;;  %v483_v47 = vsel %vm480_vm6, %v482_v22, %v478_v21  ;;  %vm492_vm9 = vmor %vm490_vm8, %vm491_vm7  ;;  %v511_v35 = vand.u32 2147483648, %v442_v61  ;;  %vm505_vm12 = vweird.f32 %v442_v61 }
 0x356   :  { %624 = vmatpush.msra.mxu3 %v913_v2  ;;  %v487_v7 = vsub.f32 1.0, %v486_v59  ;;  %v484_v55 = vmul.f32 %v1329_v63, %v483_v47  ;;  %v509_v37 = vand.u32 2147483647, %v442_v61 }
 0x357   :  { %v512_v39 = vor.u32 1.1754944e-38, %v511_v35 }
 0x358   :  { %625 = vmatpush.msra.mxu3 %v917_v4  ;;  %v488_v18 = vmul.f32 %v959_v49, %v487_v7  ;;  %vm510_vm14 = vcmp.eq.f32.partialorder %v509_v37, 8.507059e+37  ;;  %v669_v37 = vld [vmem:[%s1494_s12 + $0x18] sm:$0xff] }
 0x359   :  { %692 = vmatpush.msra.mxu0 %v669_v37 }
 0x35a   :  { %626 = vmatpush.msra.mxu3 %v918_v11  ;;  %v489_v25 = vadd.f32 %v959_v49, %v488_v18 }
 0x35b   :  { %v961_v16 = vpop.eup %960  ;;  %885 = vmatmul.msk.f32.vlgmr.msra.gmra.mxu3 %vm82_vm0, %v469_v12 }
 0x35c   :  { %v501_v23 = vmul.f32 %v961_v16, %v442_v61  ;;  %v445_v45 = vpop.xlane.xlu1 %444  ;;  %v493_v31 = vsel %vm492_vm9, %v959_v49, %v489_v25  ;;  %vm506_vm11 = vweird.f32 %v961_v16 }
 0x35d   :  { %962 = vrcp.f32 %v445_v45  ;;  %v498_v32 = vsel %vm495_vm10, %v497_v19, %v493_v31  ;;  %vm507_vm13 = vmor %vm505_vm12, %vm506_vm11  ;;  %v526_v43 = vand.u32 2147483648, %v445_v45  ;;  %vm520_vm1 = vweird.f32 %v445_v45 }
 0x35e   :  { %v502_v24 = vsub.f32 1.0, %v501_v23  ;;  %v499_v36 = vmul.f32 %v1333_v8, %v498_v32  ;;  %v524_v48 = vand.u32 2147483647, %v445_v45 }
 0x35f   :  { %v527_v49 = vor.u32 1.1754944e-38, %v526_v43 }
 0x360   :  { %v503_v30 = vmul.f32 %v961_v16, %v502_v24  ;;  %vm525_vm3 = vcmp.eq.f32.partialorder %v524_v48, 8.507059e+37 }
 0x362   :  { %v504_v34 = vadd.f32 %v961_v16, %v503_v30 }
 0x363   :  { %v963_v28 = vpop.eup %962  ;;  %886 = vmatmul.msk.f32.gmra.mxu3 %vm82_vm0, %v484_v55 }
 0x364   :  { %v516_v20 = vmul.f32 %v963_v28, %v445_v45  ;;  %v508_v38 = vsel %vm507_vm13, %v961_v16, %v504_v34  ;;  %vm521_vm15 = vweird.f32 %v963_v28 }
 0x365   :  { %v513_v29 = vsel %vm510_vm14, %v512_v39, %v508_v38  ;;  %vm522_vm2 = vmor %vm520_vm1, %vm521_vm15  ;;  %v667_v38 = vld [vmem:[%s1494_s12 + $0x8] sm:$0xff] }
 0x366   :  { %v517_v33 = vsub.f32 1.0, %v516_v20  ;;  %v514_v44 = vmul.f32 %v1337_v13, %v513_v29 }
 0x368   :  { %v518_v63 = vmul.f32 %v963_v28, %v517_v33 }
 0x36a   :  { %v519_v42 = vadd.f32 %v963_v28, %v518_v63 }
 0x36b   :  { %887 = vmatmul.msk.f32.gmra.mxu3 %vm82_vm0, %v499_v36 }
 0x36c   :  { %v523_v8 = vsel %vm522_vm2, %v963_v28, %v519_v42  ;;  %v451_v50 = vpop.xlane.xlu1 %450 }
 0x36d   :  { %v528_v51 = vsel %vm525_vm3, %v527_v49, %v523_v8  ;;  %964 = vrcp.f32 %v451_v50  ;;  %v556_v22 = vand.u32 2147483648, %v451_v50  ;;  %vm550_vm9 = vweird.f32 %v451_v50 }
 0x36e   :  { %v529_v54 = vmul.f32 %v1344_v17, %v528_v51  ;;  %v554_v24 = vand.u32 2147483647, %v451_v50 }
 0x36f   :  { %v557_v55 = vor.u32 1.1754944e-38, %v556_v22  ;;  %v764_v22 = vld [vmem:[%s1496_s14 + $0x18] sm:$0xff] }
 0x370   :  { %vm555_vm11 = vcmp.eq.f32.partialorder %v554_v24, 8.507059e+37 }
 0x373   :  { %888 = vmatmul.msk.f32.gmra.mxu3 %vm82_vm0, %v514_v44  ;;  %v965_v59 = vpop.eup %964 }
 0x374   :  { %v546_v61 = vmul.f32 %v965_v59, %v451_v50  ;;  %vm551_vm8 = vweird.f32 %v965_v59 }
 0x375   :  { %vm552_vm10 = vmor %vm550_vm9, %vm551_vm8 }
 0x376   :  { %v547_v13 = vsub.f32 1.0, %v546_v61 }
 0x378   :  { %v548_v10 = vmul.f32 %v965_v59, %v547_v13 }
 0x37a   :  { %v549_v21 = vadd.f32 %v965_v59, %v548_v10 }
 0x37b   :  { %889 = vmatmul.msk.f32.gmra.mxu3 %vm82_vm0, %v529_v54 }
 0x37c   :  { %v448_v57 = vpop.xlane.xlu0 %447  ;;  %v553_v26 = vsel %vm552_vm10, %v965_v59, %v549_v21 }
 0x37d   :  { %966 = vrcp.f32 %v448_v57  ;;  %v541_v9 = vand.u32 2147483648, %v448_v57  ;;  %v539_v12 = vand.u32 2147483647, %v448_v57  ;;  %vm535_vm5 = vweird.f32 %v448_v57 }
 0x37e   :  { %v558_v28 = vsel %vm555_vm11, %v557_v55, %v553_v26  ;;  %v807_v55 = vld [vmem:[%s1498_s16 + $0x38] sm:$0xff] }
 0x37f   :  { %v542_v17 = vor.u32 1.1754944e-38, %v541_v9  ;;  %vm540_vm7 = vcmp.eq.f32.partialorder %v539_v12, 8.507059e+37  ;;  %v559_v20 = vmul.f32 %v1351_v46, %v558_v28  ;;  %v668_v46 = vld [vmem:[%s1494_s12 + $0x10] sm:$0xff]  ;;  %827 = vmatpush.msrb.mxu1 %v807_v55  ;;  %v805_v28 = vld [vmem:[%s1498_s16 + $0x28] sm:$0xff] }
 0x380   :  { %693 = vmatpush.msra.mxu0 %v668_v46 }
 0x382   :  { %694 = vmatpush.msra.mxu0 %v667_v38 }
 0x383   :  { %v967_v2 = vpop.eup %966 }
 0x384   :  { %v531_v4 = vmul.f32 %v967_v2, %v448_v57  ;;  %vm536_vm4 = vweird.f32 %v967_v2 }
 0x385   :  { %v454_v6 = vpop.xlane.xlu2 %453  ;;  %vm537_vm6 = vmor %vm535_vm5, %vm536_vm4 }
 0x386   :  { %v532_v7 = vsub.f32 1.0, %v531_v4  ;;  %968 = vrcp.f32 %v454_v6  ;;  %v571_v31 = vand.u32 2147483648, %v454_v6  ;;  %vm565_vm13 = vweird.f32 %v454_v6 }
 0x387   :  { %v569_v19 = vand.u32 2147483647, %v454_v6 }
 0x388   :  { %v533_v11 = vmul.f32 %v967_v2, %v532_v7  ;;  %v572_v32 = vor.u32 1.1754944e-38, %v571_v31 }
 0x389   :  { %vm570_vm15 = vcmp.eq.f32.partialorder %v569_v19, 8.507059e+37  ;;  %v804_v19 = vld [vmem:[%s1498_s16 + $0x20] sm:$0xff] }
 0x38a   :  { %v534_v15 = vadd.f32 %v967_v2, %v533_v11 }
 0x38c   :  { %v969_v16 = vpop.eup %968  ;;  %v538_v18 = vsel %vm537_vm6, %v967_v2, %v534_v15 }
 0x38d   :  { %v561_v23 = vmul.f32 %v969_v16, %v454_v6  ;;  %v543_v45 = vsel %vm540_vm7, %v542_v17, %v538_v18  ;;  %vm566_vm12 = vweird.f32 %v969_v16  ;;  %vm812_vm7 = vcmask 523264  }
 0x38e   :  { %v544_v47 = vmul.f32 %v1355_v40, %v543_v45  ;;  %vm567_vm14 = vmor %vm565_vm13, %vm566_vm12  ;;  %v762_v45 = vld [vmem:[%s1496_s14 + $0x8] sm:$0xff] }
 0x38f   :  { %v562_v25 = vsub.f32 1.0, %v561_v23  ;;  %v763_v23 = vld [vmem:[%s1496_s14 + $0x10] sm:$0xff] }
 0x390   :  { %890 = vmatmul.msk.f32.gmra.mxu3 %vm82_vm0, %v544_v47  ;;  %v761_v47 = vld [vmem:[%s1496_s14] sm:$0xff] }
 0x391   :  { %v563_v27 = vmul.f32 %v969_v16, %v562_v25 }
 0x393   :  { %v564_v30 = vadd.f32 %v969_v16, %v563_v27  ;;  %v806_v27 = vld [vmem:[%s1498_s16 + $0x30] sm:$0xff] }
 0x394   :  { %828 = vmatpush.msrb.mxu1 %v806_v27 }
 0x395   :  { %v568_v40 = vsel %vm567_vm14, %v969_v16, %v564_v30 }
 0x396   :  { %v573_v33 = vsel %vm570_vm15, %v572_v32, %v568_v40  ;;  %829 = vmatpush.msrb.mxu1 %v805_v28  ;;  %v803_v32 = vld [vmem:[%s1498_s16 + $0x18] sm:$0xff] }
 0x397   :  { %v574_v34 = vmul.f32 %v1359_v41, %v573_v33  ;;  %v666_v41 = vld [vmem:[%s1494_s12] sm:$0xff] }
 0x398   :  { %891 = vmatmul.msk.f32.gmra.mxu3 %vm82_vm0, %v559_v20  ;;  %695 = vmatpush.msra.mxu0 %v666_v41  ;;  %v924_v41 = vld [vmem:[%s1488_s6] ss:$0 sm:$0xff] }
 0x399   :  { %830 = vmatpush.msrb.mxu1 %v804_v19 }
 0x39a   :  { %787 = vmatpush.msrb.mxu0 %v764_v22 }
 0x39b   :  { %831 = vmatpush.msrb.mxu1 %v803_v32 }
 0x39c   :  { %788 = vmatpush.msrb.mxu0 %v763_v23 }
 0x39e   :  { %789 = vmatpush.msrb.mxu0 %v762_v45 }
 0x3a0   :  { %892 = vmatmul.msk.f32.gmra.mxu3 %vm82_vm0, %v574_v34  ;;  %790 = vmatpush.msrb.mxu0 %v761_v47  ;;  %v802_v34 = vld [vmem:[%s1498_s16 + $0x10] sm:$0xff] }
 0x3a1   :  { %832 = vmatpush.msrb.mxu1 %v802_v34 }
 0x3de   :  { %v628_v35 = vpop.f32.mrf.mxu3 }
 0x3df   :  { %v652_v44 = vmul.f32 %v628_v35, %v1260_v52 }
 0x3e6   :  { %v631_v36 = vpop.f32.mrf.mxu3 }
 0x3e7   :  { %v653_v59 = vmul.f32 %v631_v36, %v1265_v53 }
 0x3ee   :  { %v634_v63 = vpop.f32.mrf.mxu3 }
 0x3ef   :  { %v654_v43 = vmul.f32 %v634_v63, %v1278_v56 }
 0x3f1   :  { %v660_v8 = vadd.f32 %v654_v43, %v652_v44  ;;  %v925_v43 = vld [vmem:[%s1489_s7] ss:$0 sm:$0xff] }
 0x3f6   :  { %v637_v39 = vpop.f32.mrf.mxu3 }
 0x3f7   :  { %v655_v54 = vmul.f32 %v637_v39, %v1285_v58 }
 0x3f9   :  { %v661_v2 = vadd.f32 %v655_v54, %v653_v59 }
 0x3fe   :  { %v640_v29 = vpop.f32.mrf.mxu3 }
 0x3ff   :  { %v656_v48 = vmul.f32 %v640_v29, %v1292_v60 }
 0x401   :  { %v662_v50 = vadd.f32 %v660_v8, %v656_v48 }
 0x413   :  { %v643_v42 = vpop.f32.mrf.mxu3 }
 0x414   :  { %v657_v61 = vmul.f32 %v643_v42, %v1299_v62 }
 0x416   :  { %v663_v13 = vadd.f32 %v661_v2, %v657_v61  ;;  %v800_v61 = vld [vmem:[%s1498_s16] sm:$0xff] }
 0x417   :  { %v926_v2 = vld [vmem:[%s1497_s15] ss:$0 sm:$0xff]  ;;  %s1031_s15 = smov [#allocation5]  }
 0x41b   :  { %v646_v49 = vpop.f32.mrf.mxu3 }
 0x41c   :  { %v658_v51 = vmul.f32 %v646_v49, %v1306_v0  ;;  %v923_v0 = vld [vmem:[%s1495_s13] ss:$0 sm:$0xff] }
 0x41e   :  { %v664_v57 = vadd.f32 %v662_v50, %v658_v51 }
 0x420   :  { %893 = vmatmul.msk.f32.vlgmr.msra.gmra.mxu0 %vm82_vm0, %v664_v57 }
 0x423   :  { %v649_v56 = vpop.f32.mrf.mxu3 }
 0x424   :  { %v659_v52 = vmul.f32 %v649_v56, %v1313_v3 }
 0x426   :  { %v665_v60 = vadd.f32 %v663_v13, %v659_v52 }
 0x428   :  { %894 = vmatmul.msk.f32.gmra.mxu0 %vm82_vm0, %v665_v60 }
 0x49d   :  { %v697_v58 = vpop.f32.mrf.mxu0 }
 0x49e   :  { %v698_v4 = vadd.f32 %v923_v0, %v697_v58 }
 0x4a0   :  { %v1405_v53 = vadd.f32 %v698_v4, %v1139_v1  ;;  %v927_v4 = vld [vmem:[%s1499_s17] ss:$0 sm:$0xff] }
 0x4a2   :  { %v707_v62 = vsel %vm82_vm0, %v1405_v53, 0.0 }
 0x4a3   :  { %708 = vadd.xlane.f32.xlu1 %v707_v62 }
 0x4a5   :  { %v700_v6 = vpop.f32.mrf.mxu0 }
 0x4a6   :  { %v701_v7 = vadd.f32 %v923_v0, %v700_v6 }
 0x4a8   :  { %v1410_v3 = vadd.f32 %v701_v7, %v1150_v5 }
 0x4aa   :  { %v710_v9 = vsel %vm82_vm0, %v1410_v3, 0.0 }
 0x4ab   :  { %711 = vadd.xlane.f32.xlu1 %v710_v9 }
 0x516   :  { %v709_v10 = vpop.xlane.xlu1 %708 }
 0x517   :  { %v713_v11 = vmul.f32 %v709_v10, %v1155_v14 }
 0x519   :  { %v715_v12 = vsub.f32 %v1405_v53, %v713_v11 }
 0x51b   :  { %v717_v1 = vmul.f32 %v715_v12, %v715_v12 }
 0x51d   :  { %v719_v15 = vsel %vm82_vm0, %v717_v1, 0.0 }
 0x51e   :  { %720 = vadd.xlane.f32.xlu1 %v719_v15  ;;  %v712_v17 = vpop.xlane.xlu1 %711 }
 0x51f   :  { %v714_v16 = vmul.f32 %v712_v17, %v1155_v14 }
 0x521   :  { %v716_v18 = vsub.f32 %v1410_v3, %v714_v16 }
 0x523   :  { %v718_v5 = vmul.f32 %v716_v18, %v716_v18 }
 0x525   :  { %v722_v21 = vsel %vm82_vm0, %v718_v5, 0.0 }
 0x526   :  { %723 = vadd.xlane.f32.xlu1 %v722_v21 }
 0x591   :  { %v721_v24 = vpop.xlane.xlu1 %720 }
 0x592   :  { %v725_v25 = vmul.f32 %v721_v24, %v1155_v14 }
 0x594   :  { %v727_v26 = vadd.f32 1e-05, %v725_v25 }
 0x596   :  { %970 = vrsqrt.f32 %v727_v26  ;;  %vm735_vm2 = vweird.f32 %v727_v26 }
 0x599   :  { %v724_v30 = vpop.xlane.xlu1 %723 }
 0x59a   :  { %v726_v31 = vmul.f32 %v724_v30, %v1155_v14  ;;  %v801_v14 = vld [vmem:[%s1498_s16 + $0x8] sm:$0xff]  ;;  %s852_s16 = sshll.u32 %s1031_s15, 4  ;;  %s853_s16 = int_to_ptr.vmem [resolvable:$true] %s852_s16 }
 0x59b   :  { %833 = vmatpush.msrb.mxu1 %v801_v14 }
 0x59c   :  { %v971_v20 = vpop.eup %970  ;;  %v728_v40 = vadd.f32 1e-05, %v726_v31 }
 0x59d   :  { %v730_v33 = vmul.f32 %v971_v20, %v727_v26  ;;  %vm736_vm1 = vweird.f32 %v971_v20  ;;  %834 = vmatpush.msrb.mxu1 %v800_v61 }
 0x59e   :  { %972 = vrsqrt.f32 %v728_v40  ;;  %vm737_vm3 = vmor %vm735_vm2, %vm736_vm1  ;;  %vm745_vm5 = vweird.f32 %v728_v40 }
 0x59f   :  { %v731_v35 = vmul.f32 %v971_v20, %v730_v33 }
 0x5a1   :  { %v732_v36 = vmul.f32 0.5, %v731_v35 }
 0x5a3   :  { %v733_v37 = vsub.f32 1.5, %v732_v36 }
 0x5a4   :  { %v973_v63 = vpop.eup %972 }
 0x5a5   :  { %v734_v46 = vmul.f32 %v971_v20, %v733_v37  ;;  %v740_v38 = vmul.f32 %v973_v63, %v728_v40  ;;  %vm746_vm4 = vweird.f32 %v973_v63 }
 0x5a6   :  { %vm747_vm6 = vmor %vm745_vm5, %vm746_vm4 }
 0x5a7   :  { %v738_v39 = vsel %vm737_vm3, %v971_v20, %v734_v46  ;;  %v741_v29 = vmul.f32 %v973_v63, %v740_v38 }
 0x5a8   :  { %v749_v42 = vmul.f32 %v738_v39, %v715_v12 }
 0x5a9   :  { %v742_v44 = vmul.f32 0.5, %v741_v29 }
 0x5aa   :  { %v754_v48 = vmul.f32 %v924_v41, %v749_v42 }
 0x5ab   :  { %v743_v8 = vsub.f32 1.5, %v742_v44 }
 0x5ac   :  { %v759_v49 = vadd.f32 %v925_v43, %v754_v48 }
 0x5ad   :  { %v744_v50 = vmul.f32 %v973_v63, %v743_v8 }
 0x5ae   :  { %895 = vmatmul.msk.f32.vlgmr.msrb.gmra.mxu0 %vm82_vm0, %v759_v49 }
 0x5af   :  { %v748_v51 = vsel %vm747_vm6, %v973_v63, %v744_v50 }
 0x5b0   :  { %v750_v54 = vmul.f32 %v748_v51, %v716_v18 }
 0x5b2   :  { %v755_v57 = vmul.f32 %v924_v41, %v750_v54 }
 0x5b4   :  { %v760_v59 = vadd.f32 %v925_v43, %v755_v57 }
 0x5b6   :  { %896 = vmatmul.msk.f32.gmra.mxu0 %vm82_vm0, %v760_v59 }
 0x62b   :  { %v792_v56 = vpop.f32.mrf.mxu0 }
 0x62c   :  { %v793_v13 = vadd.f32 %v926_v2, %v792_v56 }
 0x62e   :  { %v798_v52 = vmax.f32 %v793_v13, 0.0 }
 0x630   :  { %897 = vmatmul.msk.f32.vlgmr.msrb.gmra.mxu1 %vm812_vm7, %v798_v52 }
 0x633   :  { %v795_v60 = vpop.f32.mrf.mxu0 }
 0x634   :  { %v796_v0 = vadd.f32 %v926_v2, %v795_v60 }
 0x636   :  { %v799_v58 = vmax.f32 %v796_v0, 0.0 }
 0x638   :  { %898 = vmatmul.msk.f32.gmra.mxu1 %vm812_vm7, %v799_v58 }
 0x6ad   :  { %v836_v62 = vpop.f32.mrf.mxu1 }
 0x6ae   :  { %v837_v6 = vadd.f32 %v927_v4, %v836_v62 }
 0x6b0   :  { %v842_v7 = vadd.f32 %v837_v6, %v1405_v53 }
 0x6b2   :  { %v844_v9 = vsel %vm82_vm0, %v842_v7, 0.0 }
 0x6b3   :  { %846 = vst [vmem:[#allocation5] sm:$0xff] %v844_v9 }
 0x6b5   :  { %v839_v10 = vpop.f32.mrf.mxu1 }
 0x6b6   :  { %v840_v11 = vadd.f32 %v927_v4, %v839_v10 }
 0x6b8   :  { %v843_v12 = vadd.f32 %v840_v11, %v1410_v3 }
 0x6ba   :  { %v845_v1 = vsel %vm82_vm0, %v843_v12, 0.0 }
 0x6bb   :  { %847 = vst [vmem:[#allocation5 + $0x8] sm:$0xff] %v845_v1 }
 0x6bc   :  { %860 = dma.vmem_to_hbm [thread:$0]  %s853_s16, 256, %s855_s22, [#allocation4], %s1027_s1, %s1027_s1, %s1028_s20  }
 0x6bd   :  { %1024 = dma.done.wait [#allocation4], 256  }
 0x6be   :  { %1025 = vsyncadd [#allocation4], 4294967040 }
 0x6bf   :  { %865 = vsyncpa [#allocation3], 1 }
 0x6c0   :  { %866 = vsyncpa [#allocation4], 1 }

</bundles_post_ra>
